<compile_context>
chip_gen: v7x
topology: tpu7x:2x2x1
jax: 0.10.0
libtpu: 0.0.40
codegen_flags: <defaults>
</compile_context>

<pallas_src>
import numpy as np
import jax
import jax.numpy as jnp
from jax.experimental import pallas as pl
from jax.experimental.pallas import tpu as pltpu


def _round_up(x, m):
    return ((x + m - 1) // m) * m


def _pad_to(x, shape):
    pads = [(0, s - d) for s, d in zip(shape, x.shape)]
    return jnp.pad(x, pads)


def _split_dot(x_f32, y_bf16):
    """x @ y with f32 `x` and an exactly-bf16-representable (0/1 mask) `y`.

    Two bf16 MXU passes with f32 accumulation recover ~16-17 mantissa bits of x
    (near-f32 accuracy) at a third of the cost of a Precision.HIGHEST f32 matmul.
    For maximum speed the low-order pass can be dropped (~1e-3 relative accuracy).
    """
    x_hi = x_f32.astype(jnp.bfloat16)
    x_lo = (x_f32 - x_hi.astype(jnp.float32)).astype(jnp.bfloat16)
    out = jnp.dot(x_hi, y_bf16, preferred_element_type=jnp.float32)
    out = out + jnp.dot(x_lo, y_bf16, preferred_element_type=jnp.float32)
    return out


def _grouped_logp_and_rowloss(pred, target, member, member_t):
    """Segmented (per sibling-group) log-softmax + per-row CE loss for one batch tile."""
    # Per-row max is a valid stabilizer for every group (exp arguments are all <= 0).
    # Note: uses a row-wide max rather than per-group max; fine for f32 unless logits
    # within one row differ by > ~80.
    row_max = jnp.max(pred, axis=1, keepdims=True)              # [TB, 1]
    e = jnp.exp(pred - row_max)                                 # [TB, Cp]  (single EUP pass)
    group_sum = _split_dot(e, member_t)                         # [TB, Gp]
    # Clamp guards padded (all-zero) groups against log(0) -> -inf * 0 = NaN downstream.
    lse = row_max + jnp.log(jnp.maximum(group_sum, 1e-30))      # [TB, Gp]
    logz_col = _split_dot(lse, member)                          # [TB, Cp]  scatter lse to columns
    logp = pred - logz_col                                      # conditional log-probs
    row_loss = -jnp.sum(logp * target, axis=1, keepdims=True)   # [TB, 1]
    return logp, row_loss


def _cond_softmax_train_kernel(pred_ref, target_ref, member_ref, member_t_ref,
                               row_loss_ref, logp_ref):
    logp, row_loss = _grouped_logp_and_rowloss(
        pred_ref[...], target_ref[...], member_ref[...], member_t_ref[...])
    logp_ref[...] = logp
    row_loss_ref[...] = row_loss


def _cond_softmax_eval_kernel(pred_ref, target_ref, member_ref, member_t_ref, anc_t_ref,
                              row_loss_ref, clone_ref, logp_ref):
    logp, row_loss = _grouped_logp_and_rowloss(
        pred_ref[...], target_ref[...], member_ref[...], member_t_ref[...])
    logp_ref[...] = logp
    row_loss_ref[...] = row_loss
    # Joint probabilities: sum conditional log-probs along each ancestor path, then exp.
    joint = _split_dot(logp, anc_t_ref[...])                    # [TB, Cp]
    clone_ref[...] = jnp.exp(joint)


def conditional_softmax_v2(pred, target, member, anc_t, mode='train', tile_b=512):
    """loss, pred_clone (joint probs, None if mode=='TRAIN'), logp (group log-softmax of pred)."""
    B, C = pred.shape
    G = member.shape[0]

    Cp = _round_up(C, 128)                       # lane-dense class axis
    Gp = _round_up(G, 8)
    TB = _round_up(max(8, min(tile_b, B)), 8)    # batch tile (512 rows ~ >=85% HBM roofline)
    num_tiles = pl.cdiv(B, TB)
    Bp = num_tiles * TB

    pred_p = _pad_to(pred.astype(jnp.float32), (Bp, Cp))
    target_p = _pad_to(target.astype(jnp.float32), (Bp, Cp))
    # member / anc_t are 0/1 indicator matrices -> bf16 is exact and halves VMEM footprint.
    member_p = _pad_to(member, (Gp, Cp)).astype(jnp.bfloat16)   # [Gp, Cp]
    member_t_p = member_p.T                                     # [Cp, Gp]

    compute_clone = (mode != 'TRAIN')            # case-sensitive, as in the PyTorch module

    row_spec = pl.BlockSpec((TB, Cp), lambda i: (i, 0))
    resident = lambda shape: pl.BlockSpec(shape, lambda i: (0, 0))   # stays in VMEM across grid

    in_arrays = [pred_p, target_p, member_p, member_t_p]
    in_specs = [row_spec, row_spec, resident((Gp, Cp)), resident((Cp, Gp))]
    out_shapes = [jax.ShapeDtypeStruct((Bp, 1), jnp.float32)]        # per-row loss partials
    out_specs = [pl.BlockSpec((TB, 1), lambda i: (i, 0))]

    if compute_clone:
        # For very large C on v7x (64 MiB VMEM), anc_t should additionally be column-tiled with a
        # second grid axis; for moderate C the resident bf16 copy is the right trade on all chips.
        anc_t_p = _pad_to(anc_t, (Cp, Cp)).astype(jnp.bfloat16)
        in_arrays.append(anc_t_p)
        in_specs.append(resident((Cp, Cp)))
        out_shapes.append(jax.ShapeDtypeStruct((Bp, Cp), jnp.float32))   # pred_clone
        out_specs.append(row_spec)
        kernel = _cond_softmax_eval_kernel
    else:
        kernel = _cond_softmax_train_kernel
    out_shapes.append(jax.ShapeDtypeStruct((Bp, Cp), jnp.float32))       # logp
    out_specs.append(row_spec)

    outs = pl.pallas_call(
        kernel,
        grid=(num_tiles,),
        out_shape=tuple(out_shapes),
        in_specs=in_specs,
        out_specs=tuple(out_specs),
        compiler_params=pltpu.CompilerParams(
            dimension_semantics=("parallel",)),   # batch tiles are independent (2 TCs on v7x)
    )(*in_arrays)

    if compute_clone:
        row_loss, clone_p, logp_p = outs
        pred_clone = clone_p[:B, :C]
    else:
        row_loss, logp_p = outs
        pred_clone = None
    # Padded rows have target == 0 -> contribute exactly 0; divide by the true batch size.
    loss = jnp.sum(row_loss) / B
    return loss, pred_clone, logp_p[:B, :C]


# ----------------------- hierarchy setup (deterministic, in-script) -----------------------
def build_hierarchy_matrices(recursive_relation, num_classes):
    """member: [G, C] sibling-group indicator; anc_t: [C, C] ancestor-or-self (root excluded)."""
    parents = {}
    for p, children in recursive_relation.items():
        for c in children:
            parents[c] = p
    member = np.zeros((len(recursive_relation), num_classes), np.float32)
    for gi, (_, children) in enumerate(recursive_relation.items()):
        member[gi, children] = 1.0
    anc = np.zeros((num_classes, num_classes), np.float32)   # anc[c, a]
    for c in range(num_classes):
        anc[c, c] = 1.0
        n = c
        while n in parents and parents[n] != -1:
            n = parents[n]
            anc[c, n] = 1.0
    return jnp.asarray(member), jnp.asarray(anc.T)


def reference_forward(pred, target, recursive_relation, levels):
    """Pure-numpy re-implementation of the PyTorch forward (eval path), f64."""
    pred = np.asarray(pred, dtype=np.float64).copy()
    target = np.asarray(target, dtype=np.float64)
    for key in recursive_relation:
        idx = recursive_relation[key]
        x = pred[:, idx]
        m = x.max(axis=1, keepdims=True)
        lse = m + np.log(np.exp(x - m).sum(axis=1, keepdims=True))
        pred[:, idx] = x - lse
    clone = pred.copy()
    for level in levels:
        for node in levels[level]:
            if node in recursive_relation:
                clone[:, recursive_relation[node]] = (
                    pred[:, recursive_relation[node]] + clone[:, [node]])
    clone = np.exp(clone)
    loss = (-(pred * target)).sum(axis=1).mean()
    return loss, clone, pred


if __name__ == "__main__":
    # Small synthetic taxonomy (virtual root = -1; `get_hierarchy_relations` output shape):
    #   root -> {0, 1, 2};  0 -> {3,4,5};  1 -> {6,7};  2 -> {8,9,10,11,12}
    recursive_relation = {-1: [0, 1, 2], 0: [3, 4, 5], 1: [6, 7], 2: [8, 9, 10, 11, 12]}
    levels = {0: [0, 1, 2], 1: [3, 4, 5, 6, 7, 8, 9, 10, 11, 12]}
    B, C = 8, 13

    member, anc_t = build_hierarchy_matrices(recursive_relation, C)

    key = jax.random.PRNGKey(0)
    k_pred, k_leaf = jax.random.split(key)
    pred = jax.random.normal(k_pred, (B, C), dtype=jnp.float32)

    # Hierarchical multi-hot target: mark the true leaf and its parent for each sample.
    parents = {c: p for p, cs in recursive_relation.items() for c in cs}
    leaves = np.asarray(jax.random.randint(k_leaf, (B,), 3, C))
    target_np = np.zeros((B, C), np.float32)
    for b, leaf in enumerate(leaves):
        target_np[b, leaf] = 1.0
        target_np[b, parents[int(leaf)]] = 1.0
    target = jnp.asarray(target_np)

    # Eval path: loss + joint probabilities + group-wise log-softmax.
    loss, pred_clone, logp = conditional_softmax_v2(pred, target, member, anc_t, mode='eval')
    jax.block_until_ready((loss, pred_clone, logp))

    # Train path ('TRAIN', case-sensitive as in the PyTorch module): skips the ancestor matmul.
    loss_tr, clone_tr, logp_tr = conditional_softmax_v2(pred, target, member, anc_t, mode='TRAIN')
    jax.block_until_ready((loss_tr, logp_tr))
    assert clone_tr is None

    # Validate against the straight numpy port of the PyTorch forward.
    ref_loss, ref_clone, ref_logp = reference_forward(np.asarray(pred), target_np,
                                                      recursive_relation, levels)
    np.testing.assert_allclose(float(loss), ref_loss, rtol=1e-4, atol=1e-5)
    np.testing.assert_allclose(float(loss_tr), ref_loss, rtol=1e-4, atol=1e-5)
    np.testing.assert_allclose(np.asarray(pred_clone), ref_clone, rtol=1e-4, atol=5e-5)
    np.testing.assert_allclose(np.asarray(logp), ref_logp, rtol=1e-4, atol=5e-5)
    np.testing.assert_allclose(np.asarray(logp_tr), ref_logp, rtol=1e-4, atol=5e-5)

    print("KERNEL_OK")
</pallas_src>

<mosaic_0001>
module attributes {stable_mosaic.version = 11 : i64} {
  func.func @_cond_softmax_eval_kernel(%arg0: i32, %arg1: memref<8x128xf32, #tpu.memory_space<vmem>>, %arg2: memref<8x128xf32, #tpu.memory_space<vmem>>, %arg3: memref<8x128xbf16, #tpu.memory_space<vmem>>, %arg4: memref<128x8xbf16, #tpu.memory_space<vmem>>, %arg5: memref<128x128xbf16, #tpu.memory_space<vmem>>, %arg6: memref<8x1xf32, #tpu.memory_space<vmem>>, %arg7: memref<8x128xf32, #tpu.memory_space<vmem>>, %arg8: memref<8x128xf32, #tpu.memory_space<vmem>>) attributes {dimension_semantics = [#tpu.dimension_semantics<parallel>], iteration_bounds = array<i64: 1>, scalar_prefetch = 0 : i64, scratch_operands = 0 : i64, tpu.core_type = #tpu.core_type<tc>, window_params = [{transform_indices = @transform_0, window_bounds = array<i64: 8, 128>}, {transform_indices = @transform_1, window_bounds = array<i64: 8, 128>}, {pipeline_mode = #tpu.pipeline_mode<synchronous>, transform_indices = @transform_2, window_bounds = array<i64: 8, 128>}, {pipeline_mode = #tpu.pipeline_mode<synchronous>, transform_indices = @transform_3, window_bounds = array<i64: 128, 8>}, {pipeline_mode = #tpu.pipeline_mode<synchronous>, transform_indices = @transform_4, window_bounds = array<i64: 128, 128>}, {transform_indices = @transform_5, window_bounds = array<i64: 8, 1>}, {transform_indices = @transform_6, window_bounds = array<i64: 8, 128>}, {transform_indices = @transform_7, window_bounds = array<i64: 8, 128>}]} {
    %c0 = arith.constant 0 : index
    %c0_0 = arith.constant 0 : index
    %0 = vector.load %arg1[%c0, %c0_0] : memref<8x128xf32, #tpu.memory_space<vmem>>, vector<8x128xf32>
    %c0_1 = arith.constant 0 : index
    %c0_2 = arith.constant 0 : index
    %1 = vector.load %arg2[%c0_1, %c0_2] : memref<8x128xf32, #tpu.memory_space<vmem>>, vector<8x128xf32>
    %c0_3 = arith.constant 0 : index
    %c0_4 = arith.constant 0 : index
    %2 = vector.load %arg3[%c0_3, %c0_4] : memref<8x128xbf16, #tpu.memory_space<vmem>>, vector<8x128xbf16>
    %c0_5 = arith.constant 0 : index
    %c0_6 = arith.constant 0 : index
    %3 = vector.load %arg4[%c0_5, %c0_6] : memref<128x8xbf16, #tpu.memory_space<vmem>>, vector<128x8xbf16>
    %cst = arith.constant dense<0xFF800000> : vector<8xf32>
    %4 = vector.multi_reduction <maximumf>, %0, %cst [1] : vector<8x128xf32> to vector<8xf32>
    %5 = vector.shape_cast %4 : vector<8xf32> to vector<8x1xf32>
    %6 = vector.broadcast %5 : vector<8x1xf32> to vector<8x128xf32>
    %7 = arith.subf %0, %6 : vector<8x128xf32>
    %8 = math.exp %7 : vector<8x128xf32>
    %9 = arith.truncf %8 : vector<8x128xf32> to vector<8x128xbf16>
    %10 = arith.extf %9 : vector<8x128xbf16> to vector<8x128xf32>
    %11 = arith.subf %8, %10 : vector<8x128xf32>
    %12 = arith.truncf %11 : vector<8x128xf32> to vector<8x128xbf16>
    %cst_7 = arith.constant dense<0.000000e+00> : vector<8x8xf32>
    %13 = tpu.matmul %9, %3, %cst_7 {dimension_numbers = #tpu.dot_dimension_numbers<[1], [0], [0], [1], [0, 0, 1, 1], [], []>} : vector<8x128xbf16>, vector<128x8xbf16>, vector<8x8xf32> -> vector<8x8xf32>
    %cst_8 = arith.constant dense<0.000000e+00> : vector<8x8xf32>
    %14 = tpu.matmul %12, %3, %cst_8 {dimension_numbers = #tpu.dot_dimension_numbers<[1], [0], [0], [1], [0, 0, 1, 1], [], []>} : vector<8x128xbf16>, vector<128x8xbf16>, vector<8x8xf32> -> vector<8x8xf32>
    %15 = arith.addf %13, %14 : vector<8x8xf32>
    %cst_9 = arith.constant 1.000000e-30 : f32
    %16 = vector.broadcast %cst_9 : f32 to vector<8x8xf32>
    %17 = arith.maximumf %15, %16 : vector<8x8xf32>
    %18 = math.log %17 : vector<8x8xf32>
    %19 = vector.broadcast %5 : vector<8x1xf32> to vector<8x8xf32>
    %20 = arith.addf %19, %18 : vector<8x8xf32>
    %21 = arith.truncf %20 : vector<8x8xf32> to vector<8x8xbf16>
    %22 = arith.extf %21 : vector<8x8xbf16> to vector<8x8xf32>
    %23 = arith.subf %20, %22 : vector<8x8xf32>
    %24 = arith.truncf %23 : vector<8x8xf32> to vector<8x8xbf16>
    %cst_10 = arith.constant dense<0.000000e+00> : vector<8x128xf32>
    %25 = tpu.matmul %21, %2, %cst_10 {dimension_numbers = #tpu.dot_dimension_numbers<[1], [0], [0], [1], [0, 0, 1, 1], [], []>} : vector<8x8xbf16>, vector<8x128xbf16>, vector<8x128xf32> -> vector<8x128xf32>
    %cst_11 = arith.constant dense<0.000000e+00> : vector<8x128xf32>
    %26 = tpu.matmul %24, %2, %cst_11 {dimension_numbers = #tpu.dot_dimension_numbers<[1], [0], [0], [1], [0, 0, 1, 1], [], []>} : vector<8x8xbf16>, vector<8x128xbf16>, vector<8x128xf32> -> vector<8x128xf32>
    %27 = arith.addf %25, %26 : vector<8x128xf32>
    %28 = arith.subf %0, %27 : vector<8x128xf32>
    %29 = arith.mulf %28, %1 : vector<8x128xf32>
    %cst_12 = arith.constant dense<0.000000e+00> : vector<8xf32>
    %30 = vector.multi_reduction <add>, %29, %cst_12 [1] : vector<8x128xf32> to vector<8xf32>
    %31 = vector.shape_cast %30 : vector<8xf32> to vector<8x1xf32>
    %cst_13 = arith.constant 0.000000e+00 : f32
    %32 = vector.broadcast %cst_13 : f32 to vector<8x1xf32>
    %33 = arith.subf %32, %31 : vector<8x1xf32>
    %c0_14 = arith.constant 0 : index
    %c0_15 = arith.constant 0 : index
    %34 = vector.load %arg8[%c0_14, %c0_15] : memref<8x128xf32, #tpu.memory_space<vmem>>, vector<8x128xf32>
    tpu.vector_store %arg8[%c0_14, %c0_15], %28 {strides = array<i32>} : memref<8x128xf32, #tpu.memory_space<vmem>>, vector<8x128xf32>,
    %c0_16 = arith.constant 0 : index
    %c0_17 = arith.constant 0 : index
    %35 = vector.load %arg6[%c0_16, %c0_17] : memref<8x1xf32, #tpu.memory_space<vmem>>, vector<8x1xf32>
    tpu.vector_store %arg6[%c0_16, %c0_17], %33 {strides = array<i32>} : memref<8x1xf32, #tpu.memory_space<vmem>>, vector<8x1xf32>,
    %c0_18 = arith.constant 0 : index
    %c0_19 = arith.constant 0 : index
    %36 = vector.load %arg5[%c0_18, %c0_19] : memref<128x128xbf16, #tpu.memory_space<vmem>>, vector<128x128xbf16>
    %37 = arith.truncf %28 : vector<8x128xf32> to vector<8x128xbf16>
    %38 = arith.extf %37 : vector<8x128xbf16> to vector<8x128xf32>
    %39 = arith.subf %28, %38 : vector<8x128xf32>
    %40 = arith.truncf %39 : vector<8x128xf32> to vector<8x128xbf16>
    %cst_20 = arith.constant dense<0.000000e+00> : vector<8x128xf32>
    %41 = tpu.matmul %37, %36, %cst_20 {dimension_numbers = #tpu.dot_dimension_numbers<[1], [0], [0], [1], [0, 0, 1, 1], [], []>} : vector<8x128xbf16>, vector<128x128xbf16>, vector<8x128xf32> -> vector<8x128xf32>
    %cst_21 = arith.constant dense<0.000000e+00> : vector<8x128xf32>
    %42 = tpu.matmul %40, %36, %cst_21 {dimension_numbers = #tpu.dot_dimension_numbers<[1], [0], [0], [1], [0, 0, 1, 1], [], []>} : vector<8x128xbf16>, vector<128x128xbf16>, vector<8x128xf32> -> vector<8x128xf32>
    %43 = arith.addf %41, %42 : vector<8x128xf32>
    %44 = math.exp %43 : vector<8x128xf32>
    %c0_22 = arith.constant 0 : index
    %c0_23 = arith.constant 0 : index
    %45 = vector.load %arg7[%c0_22, %c0_23] : memref<8x128xf32, #tpu.memory_space<vmem>>, vector<8x128xf32>
    tpu.vector_store %arg7[%c0_22, %c0_23], %44 {strides = array<i32>} : memref<8x128xf32, #tpu.memory_space<vmem>>, vector<8x128xf32>,
    return
  }
  func.func @transform_0(%arg0: i32) -> (i32, i32) {
    %c0_i32 = arith.constant 0 : i32
    %c0_i32_0 = arith.constant 0 : i32
    return %arg0, %c0_i32 : i32, i32
  }
  func.func @transform_1(%arg0: i32) -> (i32, i32) {
    %c0_i32 = arith.constant 0 : i32
    %c0_i32_0 = arith.constant 0 : i32
    return %arg0, %c0_i32 : i32, i32
  }
  func.func @transform_2(%arg0: i32) -> (i32, i32) {
    %c0_i32 = arith.constant 0 : i32
    %c0_i32_0 = arith.constant 0 : i32
    %c0_i32_1 = arith.constant 0 : i32
    return %c0_i32, %c0_i32_0 : i32, i32
  }
  func.func @transform_3(%arg0: i32) -> (i32, i32) {
    %c0_i32 = arith.constant 0 : i32
    %c0_i32_0 = arith.constant 0 : i32
    %c0_i32_1 = arith.constant 0 : i32
    return %c0_i32, %c0_i32_0 : i32, i32
  }
  func.func @transform_4(%arg0: i32) -> (i32, i32) {
    %c0_i32 = arith.constant 0 : i32
    %c0_i32_0 = arith.constant 0 : i32
    %c0_i32_1 = arith.constant 0 : i32
    return %c0_i32, %c0_i32_0 : i32, i32
  }
  func.func @transform_5(%arg0: i32) -> (i32, i32) {
    %c0_i32 = arith.constant 0 : i32
    %c0_i32_0 = arith.constant 0 : i32
    return %arg0, %c0_i32 : i32, i32
  }
  func.func @transform_6(%arg0: i32) -> (i32, i32) {
    %c0_i32 = arith.constant 0 : i32
    %c0_i32_0 = arith.constant 0 : i32
    return %arg0, %c0_i32 : i32, i32
  }
  func.func @transform_7(%arg0: i32) -> (i32, i32) {
    %c0_i32 = arith.constant 0 : i32
    %c0_i32_0 = arith.constant 0 : i32
    return %arg0, %c0_i32 : i32, i32
  }
}

</mosaic_0001>

<bundles_post_ra>
// kernel: tpu_custom_call.1
= control target key start
LH: loop header
LB: loop body
LE: loop exit
PB: predicated region body
PF: predicated region fallthrough
CT: control target
= control target key end

     0   :  { %13 = vsyncpa [#allocation3], 0  ;;  %s932_s0 = inlined_call_operand.vmem [shape: f32[8,128], index: 0, kind: input, shape index: {}]   ;;  %s933_s1 = inlined_call_operand.vmem [shape: f32[8,128], index: 1, kind: input, shape index: {}]   ;;  %s934_s2 = inlined_call_operand.hbm [shape: bf16[8,128], index: 2, kind: input, shape index: {}]   ;;  %s935_s3 = inlined_call_operand.vmem [shape: bf16[128,8], index: 3, kind: input, shape index: {}]   ;;  %s936_s4 = inlined_call_operand.vmem [shape: bf16[128,128], index: 4, kind: input, shape index: {}]   ;;  %s937_s5 = inlined_call_operand.vmem [shape: f32[8,1], index: 5, kind: output, shape index: {0}]   ;;  %s938_s6 = inlined_call_operand.hbm [shape: f32[8,128], index: 6, kind: output, shape index: {1}]   ;;  %s939_s7 = inlined_call_operand.hbm [shape: f32[8,128], index: 7, kind: output, shape index: {2}]  }
   0x1   :  { %14 = vsyncpa [#allocation4], 0 }
   0x2   :  { %15 = vsyncpa [#allocation7], 0  ;;  %s743_s24 = smov [#allocation2]   ;;  %s671_s28 = scalar_lea.hbm %s934_s2, 64 }
   0x3   :  { %s26_s25 = sshll.u32 %s743_s24, 4  ;;  %p672_p0 = scmp.ne.s32.totalorder %s934_s2, %s671_s28  ;;  %s27_s25 = int_to_ptr.vmem [resolvable:$true] %s26_s25 }
   0x4   :  { %p675_p1 = scmp.lt.u32.totalorder %s671_s28, %s934_s2 }
   0x6   :  { %p677_p2 = pnand %p675_p1, %p672_p0 }
   0x8   :  { %680 = shalt.err (!%p677_p2)
}
   0x9   :  { %s681_s10 = scalar_lea.vmem %s27_s25, 64  ;;  %p686_p4 = scmp.lt.s32.totalorder %s27_s25, %s27_s25 }
   0xa   :  { %p682_p3 = scmp.ne.s32.totalorder %s27_s25, %s681_s10  ;;  %p687_p5 = scmp.lt.s32.totalorder %s681_s10, %s681_s10 }
   0xc   :  { %p688_p6 = por %p687_p5, %p686_p4 }
   0xe   :  { %p689_p7 = pnand %p688_p6, %p682_p3 }
  0x10   :  { %692 = shalt.err (!%p689_p7)
}
  0x11   :  { %29 = dma.hbm_to_vmem [thread:$0]  %s934_s2, 64, %s27_s25, [#allocation3]  }
  0x12   :  { %737 = dma.done.wait [#allocation3], 64  }
  0x13   :  { %738 = vsyncadd [#allocation3], 4294967232  ;;  %v744_v0 = vmov 0.0   ;;  %v805_v1 = vld [vmem:[%s932_s0] sm:$0xff]  ;;  %v650_v3 = vld [vmem:[%s935_s3 + $0x8] sm:$0xff]   ;;  %vm745_vm0 = vmmov 0  }
  0x14   :  { %543 = vmatprep.subr.bf16.mxu0 %v744_v0  ;;  %589 = vmatprep.subr.bf16.mxu1 %v744_v0  ;;  %v649_v2 = vld [vmem:[%s935_s3] sm:$0xff]   ;;  %v651_v4 = vld [vmem:[%s935_s3 + $0x10] sm:$0xff]   ;;  %v652_v5 = vld [vmem:[%s935_s3 + $0x18] sm:$0xff]   ;;  %vm206_vm1 = vcmask 1043456   ;;  %vm202_vm2 = vcmask 64512  }
  0x15   :  { %57 = vmax.xlane.f32.xlu0 %v805_v1  ;;  %544 = vmatpush3.bf16.msra.mxu0 %v649_v2  ;;  %v653_v6 = vld [vmem:[%s935_s3 + $0x20] sm:$0xff]   ;;  %v654_v7 = vld [vmem:[%s935_s3 + $0x28] sm:$0xff]   ;;  %v655_v8 = vld [vmem:[%s935_s3 + $0x30] sm:$0xff]  }
  0x16   :  { %545 = vmatprep.subr.bf16.mxu0 %v744_v0  ;;  %559 = vmatprep.mubr.msk.bf16.mxu0 %vm745_vm0, %v744_v0  ;;  %v656_v9 = vld [vmem:[%s935_s3 + $0x38] sm:$0xff]   ;;  %v40_v18 = vld [vmem:[#allocation2] sm:$0xf]  ;;  %v658_v31 = vld [vmem:[%s936_s4 + $0x8] sm:$0xff]  }
  0x17   :  { %591 = vmatprep.mubr.msk.bf16.mxu1 %vm745_vm0, %v744_v0  ;;  %v208_v19 = vsel %vm206_vm1, %v40_v18, 0  ;;  %v657_v28 = vld [vmem:[%s936_s4] sm:$0xff]   ;;  %v659_v34 = vld [vmem:[%s936_s4 + $0x10] sm:$0xff]   ;;  %v660_v35 = vld [vmem:[%s936_s4 + $0x18] sm:$0xff]  }
  0x18   :  { %590 = vmatpush3.bf16.msra.mxu1 %v208_v19  ;;  %v661_v36 = vld [vmem:[%s936_s4 + $0x20] sm:$0xff]   ;;  %v662_v37 = vld [vmem:[%s936_s4 + $0x28] sm:$0xff]   ;;  %v663_v38 = vld [vmem:[%s936_s4 + $0x30] sm:$0xff]  }
  0x19   :  { %546 = vmatpush3.bf16.msra.mxu0 %v650_v3  ;;  %595 = vmatprep.subr.bf16.mxu1 %v744_v0  ;;  %v664_v39 = vld [vmem:[%s936_s4 + $0x38] sm:$0xff]   ;;  %v39_v48 = vld [vmem:[%s933_s1] sm:$0xff]  ;;  %s746_s1 = smov [#allocation6]  }
  0x1a   :  { %547 = vmatprep.subr.bf16.mxu0 %v744_v0  ;;  %s470_s4 = sshll.u32 %s746_s1, 4  ;;  %s471_s4 = int_to_ptr.vmem [resolvable:$true] %s470_s4 }
  0x1b   :  { %s693_s21 = scalar_lea.vmem %s471_s4, 128  ;;  %p698_p9 = scmp.lt.s32.totalorder %s471_s4, %s471_s4 }
  0x1c   :  { %p694_p8 = scmp.ne.s32.totalorder %s471_s4, %s693_s21  ;;  %p699_p10 = scmp.lt.s32.totalorder %s693_s21, %s693_s21 }
  0x1d   :  { %548 = vmatpush3.bf16.msra.mxu0 %v651_v4 }
  0x1e   :  { %549 = vmatprep.subr.bf16.mxu0 %v744_v0  ;;  %p700_p11 = por %p699_p10, %p698_p9 }
  0x20   :  { %p701_p12 = pnand %p700_p11, %p694_p8 }
  0x21   :  { %550 = vmatpush3.bf16.msra.mxu0 %v652_v5 }
  0x22   :  { %551 = vmatprep.subr.bf16.mxu0 %v744_v0 }
  0x25   :  { %552 = vmatpush3.bf16.msra.mxu0 %v653_v6 }
  0x26   :  { %553 = vmatprep.subr.bf16.mxu0 %v744_v0 }
  0x29   :  { %554 = vmatpush3.bf16.msra.mxu0 %v654_v7 }
  0x2a   :  { %555 = vmatprep.subr.bf16.mxu0 %v744_v0 }
  0x2d   :  { %556 = vmatpush3.bf16.msra.mxu0 %v655_v8 }
  0x2e   :  { %557 = vmatprep.subr.bf16.mxu0 %v744_v0 }
  0x31   :  { %558 = vmatpush3.bf16.msra.mxu0 %v656_v9 }
  0x32   :  { %563 = vmatprep.subr.bf16.mxu0 %v744_v0 }
  0xa2   :  { %v58_v10 = vpop.xlane.xlu0 %57 }
  0xa3   :  { %v59_v11 = vsub.f32 %v805_v1, %v58_v10 }
  0xa5   :  { %v60_v12 = vmul.f32 1.442695, %v59_v11 }
  0xa7   :  { %665 = vpow2.f32 %v60_v12 }
  0xb1   :  { %v666_v13 = vpop.eup %665 }
  0xb2   :  { %v62_v14 = vpack.c.bf16 %v666_v13, %v666_v13 }
  0xb4   :  { %v63_v15 = vunpack.c.l.bf16 %v62_v14 }
  0xb6   :  { %v64_v16 = vsub.f32 %v666_v13, %v63_v15 }
  0xb8   :  { %v65_v17 = vpack.c.bf16 %v64_v16, %v64_v16 }
  0xba   :  { %560 = vmatmul.mubr.bf16.vlgmr.msra.gmra.mrb[0].mxu0 %v65_v17 }
  0xbb   :  { %564 = vmatpush3.bf16.msra.mxu0 %v649_v2  ;;  %579 = vmatprep.mubr.msk.bf16.mxu0 %vm745_vm0, %v744_v0 }
  0xbc   :  { %565 = vmatprep.subr.bf16.mxu0 %v744_v0 }
  0xbf   :  { %566 = vmatpush3.bf16.msra.mxu0 %v650_v3 }
  0xc0   :  { %567 = vmatprep.subr.bf16.mxu0 %v744_v0 }
  0xc3   :  { %568 = vmatpush3.bf16.msra.mxu0 %v651_v4 }
  0xc4   :  { %569 = vmatprep.subr.bf16.mxu0 %v744_v0 }
  0xc7   :  { %570 = vmatpush3.bf16.msra.mxu0 %v652_v5 }
  0xc8   :  { %571 = vmatprep.subr.bf16.mxu0 %v744_v0 }
  0xcb   :  { %572 = vmatpush3.bf16.msra.mxu0 %v653_v6 }
  0xcc   :  { %573 = vmatprep.subr.bf16.mxu0 %v744_v0 }
  0xcf   :  { %574 = vmatpush3.bf16.msra.mxu0 %v654_v7 }
  0xd0   :  { %575 = vmatprep.subr.bf16.mxu0 %v744_v0 }
  0xd3   :  { %576 = vmatpush3.bf16.msra.mxu0 %v655_v8 }
  0xd4   :  { %577 = vmatprep.subr.bf16.mxu0 %v744_v0 }
  0xd7   :  { %578 = vmatpush3.bf16.msra.mxu0 %v656_v9 }
  0xd8   :  { %583 = vmatprep.subr.bf16.mxu0 %v744_v0 }
  0xda   :  { %580 = vmatmul.mubr.bf16.vlgmr.msra.gmra.mrb[0].mxu0 %v62_v14 }
  0xdb   :  { %585 = vmatprep.mubr.msk.bf16.mxu0 %vm745_vm0, %v744_v0  ;;  %584 = vmatpush3.bf16.msra.mxu0 %v208_v19 }
 0x1ad   :  { %v188_v20 = vpop.f32.mrb[0].mxu0 }
 0x1ae   :  { %v194_v21 = vmax.f32 %v188_v20, 1e-30  ;;  %v581_v22 = vpop.f32.mrb[1].mxu0 }
 0x1af   :  { %v191_v23 = vpop.f32.mrb[2].mxu0 }
 0x1b0   :  { %667 = vlog2.f32 %v194_v21  ;;  %v582_v24 = vpop.f32.mrb[3].mxu0 }
 0x1ba   :  { %v668_v25 = vpop.eup %667 }
 0x1bb   :  { %v196_v26 = vmul.f32 0.6931472, %v668_v25 }
 0x1bd   :  { %v197_v27 = vadd.f32 %v196_v26, %v58_v10 }
 0x1bf   :  { %v198_v29 = vpack.c.bf16 %v197_v27, %v197_v27 }
 0x1c1   :  { %v199_v30 = vunpack.c.l.bf16 %v198_v29  ;;  %592 = vmatmul.mubr.msk.bf16.vlgmr.msra.gmra.mrb[0].mxu1 %vm202_vm2, %v198_v29 }
 0x1c2   :  { %596 = vmatpush3.bf16.msra.mxu1 %v657_v28  ;;  %611 = vmatprep.mubr.msk.bf16.mxu1 %vm745_vm0, %v744_v0 }
 0x1c3   :  { %v200_v32 = vsub.f32 %v197_v27, %v199_v30  ;;  %597 = vmatprep.subr.bf16.mxu1 %v744_v0 }
 0x1c5   :  { %v201_v33 = vpack.c.bf16 %v200_v32, %v200_v32 }
 0x1c6   :  { %598 = vmatpush3.bf16.msra.mxu1 %v658_v31 }
 0x1c7   :  { %586 = vmatmul.mubr.msk.bf16.vlgmr.msra.gmra.mrb[4].mxu0 %vm202_vm2, %v201_v33  ;;  %599 = vmatprep.subr.bf16.mxu1 %v744_v0 }
 0x1ca   :  { %600 = vmatpush3.bf16.msra.mxu1 %v659_v34 }
 0x1cb   :  { %601 = vmatprep.subr.bf16.mxu1 %v744_v0 }
 0x1ce   :  { %602 = vmatpush3.bf16.msra.mxu1 %v660_v35 }
 0x1cf   :  { %603 = vmatprep.subr.bf16.mxu1 %v744_v0 }
 0x1d2   :  { %604 = vmatpush3.bf16.msra.mxu1 %v661_v36 }
 0x1d3   :  { %605 = vmatprep.subr.bf16.mxu1 %v744_v0 }
 0x1d6   :  { %606 = vmatpush3.bf16.msra.mxu1 %v662_v37 }
 0x1d7   :  { %607 = vmatprep.subr.bf16.mxu1 %v744_v0 }
 0x1da   :  { %608 = vmatpush3.bf16.msra.mxu1 %v663_v38 }
 0x1db   :  { %609 = vmatprep.subr.bf16.mxu1 %v744_v0 }
 0x1de   :  { %610 = vmatpush3.bf16.msra.mxu1 %v664_v39 }
 0x1df   :  { %615 = vmatprep.subr.bf16.mxu1 %v744_v0 }
 0x294   :  { %v287_v40 = vpop.f32.mrb[0].mxu1 }
 0x295   :  { %v593_v41 = vpop.f32.mrb[1].mxu1 }
 0x296   :  { %v290_v42 = vpop.f32.mrb[2].mxu1 }
 0x297   :  { %v594_v43 = vpop.f32.mrb[3].mxu1 }
 0x29a   :  { %v244_v44 = vpop.f32.mrb[4].mxu0 }
 0x29b   :  { %v288_v45 = vadd.f32 %v287_v40, %v244_v44  ;;  %v587_v46 = vpop.f32.mrb[5].mxu0 }
 0x29c   :  { %v247_v47 = vpop.f32.mrb[6].mxu0 }
 0x29d   :  { %v293_v49 = vsub.f32 %v805_v1, %v288_v45  ;;  %v588_v50 = vpop.f32.mrb[7].mxu0 }
 0x29f   :  { %v317_v51 = vpack.c.bf16 %v293_v49, %v293_v49  ;;  %298 = vst [vmem:[#allocation6] sm:$0xff] %v293_v49  ;;  %v294_v52 = vmul.f32 %v293_v49, %v39_v48 }
 0x2a1   :  { %295 = vadd.xlane.f32.xlu0 %v294_v52  ;;  %v318_v53 = vunpack.c.l.bf16 %v317_v51 }
 0x2a3   :  { %v319_v54 = vsub.f32 %v293_v49, %v318_v53 }
 0x2a5   :  { %v320_v55 = vpack.c.bf16 %v319_v54, %v319_v54 }
 0x2a7   :  { %612 = vmatmul.mubr.bf16.vlgmr.msra.gmra.mrb[4].mxu1 %v320_v55 }
 0x2a8   :  { %616 = vmatpush3.bf16.msra.mxu1 %v657_v28  ;;  %631 = vmatprep.mubr.msk.bf16.mxu1 %vm745_vm0, %v744_v0 }
 0x2a9   :  { %617 = vmatprep.subr.bf16.mxu1 %v744_v0 }
 0x2ac   :  { %618 = vmatpush3.bf16.msra.mxu1 %v658_v31 }
 0x2ad   :  { %619 = vmatprep.subr.bf16.mxu1 %v744_v0 }
 0x2b0   :  { %620 = vmatpush3.bf16.msra.mxu1 %v659_v34 }
 0x2b1   :  { %621 = vmatprep.subr.bf16.mxu1 %v744_v0 }
 0x2b4   :  { %622 = vmatpush3.bf16.msra.mxu1 %v660_v35 }
 0x2b5   :  { %623 = vmatprep.subr.bf16.mxu1 %v744_v0 }
 0x2b8   :  { %624 = vmatpush3.bf16.msra.mxu1 %v661_v36 }
 0x2b9   :  { %625 = vmatprep.subr.bf16.mxu1 %v744_v0 }
 0x2bc   :  { %626 = vmatpush3.bf16.msra.mxu1 %v662_v37 }
 0x2bd   :  { %627 = vmatprep.subr.bf16.mxu1 %v744_v0 }
 0x2c0   :  { %628 = vmatpush3.bf16.msra.mxu1 %v663_v38 }
 0x2c1   :  { %629 = vmatprep.subr.bf16.mxu1 %v744_v0 }
 0x2c4   :  { %630 = vmatpush3.bf16.msra.mxu1 %v664_v39 }
 0x2c7   :  { %632 = vmatmul.mubr.bf16.vlgmr.msra.gmra.mrb[4].mxu1 %v317_v51 }
 0x2c8   :  { %704 = shalt.err (!%p701_p12)
}
 0x2c9   :  { %s705_s24 = scalar_lea.hbm %s939_s7, 128 }
 0x2ca   :  { %p706_p13 = scmp.ne.s32.totalorder %s939_s7, %s705_s24  ;;  %p709_p0 = scmp.lt.u32.totalorder %s705_s24, %s939_s7 }
 0x2cc   :  { %p711_p1 = pnand %p709_p0, %p706_p13 }
 0x2ce   :  { %714 = shalt.err (!%p711_p1)
}
 0x2cf   :  { %473 = dma.vmem_to_hbm [thread:$0]  %s471_s4, 128, %s939_s7, [#allocation7]   ;;  %vm299_vm3 = vcmask 7168  }
 0x2d0   :  { %s747_s9 = smov [#allocation5]  }
 0x2d1   :  { %s460_s10 = sshll.u32 %s747_s9, 4  ;;  %s461_s10 = int_to_ptr.vmem [resolvable:$true] %s460_s10 }
 0x2d2   :  { %s715_s11 = scalar_lea.vmem %s461_s10, 128  ;;  %p720_p3 = scmp.lt.s32.totalorder %s461_s10, %s461_s10 }
 0x2d3   :  { %p716_p2 = scmp.ne.s32.totalorder %s461_s10, %s715_s11  ;;  %p721_p4 = scmp.lt.s32.totalorder %s715_s11, %s715_s11 }
 0x2d5   :  { %p722_p5 = por %p721_p4, %p720_p3 }
 0x2d7   :  { %p723_p6 = pnand %p722_p5, %p716_p2 }
 0x32e   :  { %v296_v56 = vpop.xlane.xlu0 %295 }
 0x32f   :  { %v297_v57 = vsub.f32 0.0, %v296_v56 }
 0x331   :  { %300 = vst.msk [vmem:[%s937_s5] sm:$0xff] %vm299_vm3, %v297_v57 }
 0x39a   :  { %v443_v58 = vpop.f32.mrb[4].mxu1 }
 0x39b   :  { %v449_v59 = vmul.f32 1.442695, %v443_v58  ;;  %v633_v60 = vpop.f32.mrb[5].mxu1 }
 0x39c   :  { %v446_v61 = vpop.f32.mrb[6].mxu1 }
 0x39d   :  { %669 = vpow2.f32 %v449_v59  ;;  %v634_v62 = vpop.f32.mrb[7].mxu1 }
 0x3a7   :  { %v670_v63 = vpop.eup %669 }
 0x3a8   :  { %451 = vst [vmem:[#allocation5] sm:$0xff] %v670_v63 }
 0x3a9   :  { %726 = shalt.err (!%p723_p6)
}
 0x3aa   :  { %s727_s12 = scalar_lea.hbm %s938_s6, 128 }
 0x3ab   :  { %p728_p7 = scmp.ne.s32.totalorder %s938_s6, %s727_s12  ;;  %p731_p8 = scmp.lt.u32.totalorder %s727_s12, %s938_s6 }
 0x3ad   :  { %p733_p9 = pnand %p731_p8, %p728_p7 }
 0x3af   :  { %736 = shalt.err (!%p733_p9)
}
 0x3b0   :  { %463 = dma.vmem_to_hbm [thread:$0]  %s461_s10, 128, %s938_s6, [#allocation4]  }
 0x3b1   :  { %739 = dma.done.wait [#allocation4], 128  }
 0x3b2   :  { %740 = vsyncadd [#allocation4], 4294967168 }
 0x3b3   :  { %741 = dma.done.wait [#allocation7], 128  }
 0x3b4   :  { %742 = vsyncadd [#allocation7], 4294967168 }
 0x3b5   :  { %482 = vsyncpa [#allocation3], 1 }
 0x3b6   :  { %483 = vsyncpa [#allocation4], 1 }
 0x3b7   :  { %484 = vsyncpa [#allocation7], 1 }

</bundles_post_ra>
